<compile_context>
chip_gen: v7x
topology: tpu7x:2x2x1
jax: 0.10.0
libtpu: 0.0.40
codegen_flags: <defaults>
</compile_context>

<pallas_src>
import functools

import jax
import jax.numpy as jnp
from jax.experimental import pallas as pl
from jax.experimental.pallas import tpu as pltpu


def _round_up(n, m):
    return (n + m - 1) // m * m


# ---------------------------------------------------------------------------
# Kernel
# ---------------------------------------------------------------------------
def _mlp_kernel(x_ref, w1_ref, b1_ref, w2_ref, b2_ref, o_ref):
    # x: (TB, N) cdt; w1: (N, H) cdt; b1: (1, H) f32;
    # w2: (H, Op) cdt; b2: (1, Op) f32; o: (TB, Op) cdt.
    h = jnp.dot(x_ref[...], w1_ref[...], preferred_element_type=jnp.float32)
    h = jnp.maximum(h + b1_ref[...], 0.0)              # bias + ReLU in f32 (VPU)
    y = jnp.dot(h.astype(w2_ref.dtype), w2_ref[...],
                preferred_element_type=jnp.float32) + b2_ref[...]
    # sigmoid(y) = 1 / (1 + exp(-y)); exp and approx-reciprocal both use the
    # EUP slot instead of the VPU divide path.
    o_ref[...] = pl.reciprocal(1.0 + jnp.exp(-y), approx=True).astype(o_ref.dtype)


# ---------------------------------------------------------------------------
# One-time parameter packing (hoists per-call casts out of the hot path)
# ---------------------------------------------------------------------------
def prepare_params(w1, b1, w2, b2, *, N, use_bf16=True):
    """Pack weights for the kernel (call once, reuse across forward calls).

    Expects weights already in (in, out) layout, i.e. the transpose of
    torch.nn.Linear's (out, in):
      w1: (N, N^2//2), b1: (N^2//2,), w2: (N^2//2, N^2), b2: (N^2,)

    Matmul operands are cast to bf16, biases stay f32 (shaped (1, out) for
    lane broadcast), and the output feature dim is zero-padded up to a
    multiple of 128 lanes so the kernel's store stays unmasked.  Padded
    columns are sliced off again in matrix_generator_forward.
    """
    H = N * N // 2
    O = N * N
    assert w1.shape == (N, H) and w2.shape == (H, O), (w1.shape, w2.shape)
    O_pad = _round_up(O, 128)
    cdt = jnp.bfloat16 if use_bf16 else jnp.float32
    if O_pad != O:
        w2 = jnp.pad(w2, ((0, 0), (0, O_pad - O)))
        b2 = jnp.pad(b2, (0, O_pad - O))
    return (w1.astype(cdt),
            b1.reshape(1, H).astype(jnp.float32),
            w2.astype(cdt),
            b2.reshape(1, O_pad).astype(jnp.float32))


# ---------------------------------------------------------------------------
# Batch-tile selection
# ---------------------------------------------------------------------------
_TILE_CANDIDATES = (1024, 512, 256, 128)


def _select_tile_b(B, o_pad, out_itemsize, out_vmem_budget=(12 << 20)):
    """Pick the batch tile: fit VMEM, minimize padding waste, prefer grid>=2
    (v7x dual-TC) and bigger tiles (amortize ~0.35us/step grid overhead)."""
    fits = [t for t in _TILE_CANDIDATES
            if 2 * t * o_pad * out_itemsize <= out_vmem_budget]
    if not fits:
        fits = [_TILE_CANDIDATES[-1]]
    smallest = fits[-1]
    if B < smallest:
        # Tiny batch: single tile padded to a sublane-friendly multiple of 16.
        return _round_up(max(B, 1), 16)
    best_key, best_t = None, None
    for t in fits:
        b_pad = _round_up(B, t)
        waste = b_pad - B
        grid = b_pad // t
        key = (waste, 0 if grid >= 2 else 1, -t)
        if best_key is None or key < best_key:
            best_key, best_t = key, t
    return best_t


# ---------------------------------------------------------------------------
# pallas_call wrapper
# ---------------------------------------------------------------------------
@functools.partial(jax.jit, static_argnames=("tile_b", "single_buffer_weights"))
def _forward_padded(x_pad, w1, b1, w2, b2, *, tile_b, single_buffer_weights):
    B_pad, N = x_pad.shape
    H = w1.shape[1]
    O_pad = w2.shape[1]
    cdt = x_pad.dtype
    item = jnp.dtype(cdt).itemsize

    def wspec(shape):
        if single_buffer_weights:
            # Constant index_map -> one fetch suffices; a single buffer halves
            # the resident-weight VMEM footprint (matters on v7x, 64 MiB/TC).
            return pl.BlockSpec(shape, lambda i: (0, 0),
                                pipeline_mode=pl.Buffered(1))
        return pl.BlockSpec(shape, lambda i: (0, 0))

    w_bufs = 1 if single_buffer_weights else 2
    weight_bytes = (w1.size + w2.size) * item + (b1.size + b2.size) * 4
    vmem_est = (w_bufs * weight_bytes
                + 2 * tile_b * N * item           # x double buffer
                + 2 * tile_b * O_pad * item       # output double buffer
                + tile_b * (H + O_pad) * 4)       # f32 intermediates
    vmem_limit = int(min(64 << 20, max(32 << 20, 2 * vmem_est)))

    cost = pl.CostEstimate(
        flops=2 * B_pad * (N * H + H * O_pad),
        transcendentals=2 * B_pad * O_pad,        # exp + reciprocal
        bytes_accessed=(B_pad * N * item + weight_bytes + B_pad * O_pad * item),
    )

    return pl.pallas_call(
        _mlp_kernel,
        out_shape=jax.ShapeDtypeStruct((B_pad, O_pad), cdt),
        grid=(B_pad // tile_b,),
        in_specs=[
            pl.BlockSpec((tile_b, N), lambda i: (i, 0)),   # x tile (pipelined)
            wspec((N, H)),                                  # w1 (resident)
            wspec((1, H)),                                  # b1
            wspec((H, O_pad)),                              # w2 (resident)
            wspec((1, O_pad)),                              # b2
        ],
        out_specs=pl.BlockSpec((tile_b, O_pad), lambda i: (i, 0)),
        compiler_params=pltpu.CompilerParams(
            dimension_semantics=("parallel",),
            vmem_limit_bytes=vmem_limit),
        cost_estimate=cost,
    )(x_pad, w1, b1, w2, b2)


# One-time probe: does this JAX build accept pl.Buffered(1) on a BlockSpec?
_SINGLE_BUFFER_OK = None


def matrix_generator_forward(x, params, *, N, out_dtype=jnp.float32):
    """x: (B, N) f32.  params: output of prepare_params().

    Returns (B, N, N) in out_dtype, matching torch's reshape(-1, N, N).
    """
    global _SINGLE_BUFFER_OK
    w1, b1, w2, b2 = params
    B = x.shape[0]
    O = N * N
    o_pad = w2.shape[1]
    cdt = w1.dtype                      # compute/store dtype (bf16 by default)
    tile_b = _select_tile_b(B, o_pad, jnp.dtype(cdt).itemsize)
    B_pad = _round_up(B, tile_b)

    x_k = x.astype(cdt)
    if B_pad != B:
        x_k = jnp.pad(x_k, ((0, B_pad - B), (0, 0)))

    def run(single_buf):
        return _forward_padded(x_k, w1, b1, w2, b2, tile_b=tile_b,
                               single_buffer_weights=single_buf)

    if _SINGLE_BUFFER_OK is None:
        try:
            y = run(True)
            _SINGLE_BUFFER_OK = True
        except Exception:
            _SINGLE_BUFFER_OK = False
            y = run(False)
    else:
        y = run(_SINGLE_BUFFER_OK)

    # Drop batch/lane padding, upcast, reshape outside the kernel (keeps the
    # kernel's output store lane-dense and bf16).
    return y[:B, :O].astype(out_dtype).reshape(-1, N, N)


# ---------------------------------------------------------------------------
# Init mimicking torch.nn.Linear defaults (uniform +-1/sqrt(fan_in))
# ---------------------------------------------------------------------------
def _init_params(key, N):
    hidden = N * N // 2
    out = N * N
    k1, k2, k3, k4 = jax.random.split(key, 4)
    bound1 = 1.0 / jnp.sqrt(N)
    bound2 = 1.0 / jnp.sqrt(hidden)
    # Stored directly in (in, out) layout == transpose of torch's (out, in).
    w1 = jax.random.uniform(k1, (N, hidden), jnp.float32, -bound1, bound1)
    b1 = jax.random.uniform(k2, (hidden,), jnp.float32, -bound1, bound1)
    w2 = jax.random.uniform(k3, (hidden, out), jnp.float32, -bound2, bound2)
    b2 = jax.random.uniform(k4, (out,), jnp.float32, -bound2, bound2)
    return w1, b1, w2, b2


if __name__ == "__main__":
    N = 16
    key = jax.random.PRNGKey(0)
    kx, kp = jax.random.split(key)
    w1, b1, w2, b2 = _init_params(kp, N)
    params = prepare_params(w1, b1, w2, b2, N=N)

    def reference(xin):
        h = jnp.maximum(xin @ w1 + b1, 0.0)
        return jax.nn.sigmoid(h @ w2 + b2).reshape(-1, N, N)

    # Small batch (module-consistent), plus batched cases exercising the
    # waste-minimizing tile choice (600 -> tile 128) and the >=2-grid-step
    # large-tile path (1024 -> tile 512).
    for B, seed in ((2, 0), (600, 1), (1024, 2)):
        xb = jax.random.normal(jax.random.PRNGKey(seed), (B, N), jnp.float32)
        out = matrix_generator_forward(xb, params, N=N)
        jax.block_until_ready(out)
        ref = reference(xb)
        assert out.shape == (B, N, N), out.shape
        # bf16 MXU operands + bf16 output store + approx reciprocal => loosened
        # tolerance vs the pure-f32 reference.
        assert jnp.allclose(out, ref, atol=2e-2, rtol=2e-2), (
            B, float(jnp.max(jnp.abs(out - ref))))

    print("KERNEL_OK")
</pallas_src>

<mosaic_0001>
module attributes {stable_mosaic.version = 11 : i64} {
  func.func @_mlp_kernel(%arg0: i32, %arg1: memref<16x16xbf16, #tpu.memory_space<vmem>>, %arg2: memref<16x128xbf16, #tpu.memory_space<vmem>>, %arg3: memref<1x128xf32, #tpu.memory_space<vmem>>, %arg4: memref<128x256xbf16, #tpu.memory_space<vmem>>, %arg5: memref<1x256xf32, #tpu.memory_space<vmem>>, %arg6: memref<16x256xbf16, #tpu.memory_space<vmem>>) attributes {dimension_semantics = [#tpu.dimension_semantics<parallel>], iteration_bounds = array<i64: 1>, scalar_prefetch = 0 : i64, scratch_operands = 0 : i64, tpu.core_type = #tpu.core_type<tc>, window_params = [{transform_indices = @transform_0, window_bounds = array<i64: 16, 16>}, {pipeline_mode = #tpu.pipeline_mode<synchronous>, transform_indices = @transform_1, window_bounds = array<i64: 16, 128>}, {pipeline_mode = #tpu.pipeline_mode<synchronous>, transform_indices = @transform_2, window_bounds = array<i64: 1, 128>}, {pipeline_mode = #tpu.pipeline_mode<synchronous>, transform_indices = @transform_3, window_bounds = array<i64: 128, 256>}, {pipeline_mode = #tpu.pipeline_mode<synchronous>, transform_indices = @transform_4, window_bounds = array<i64: 1, 256>}, {transform_indices = @transform_5, window_bounds = array<i64: 16, 256>}]} {
    %c0 = arith.constant 0 : index
    %c0_0 = arith.constant 0 : index
    %0 = vector.load %arg1[%c0, %c0_0] : memref<16x16xbf16, #tpu.memory_space<vmem>>, vector<16x16xbf16>
    %c0_1 = arith.constant 0 : index
    %c0_2 = arith.constant 0 : index
    %1 = vector.load %arg2[%c0_1, %c0_2] : memref<16x128xbf16, #tpu.memory_space<vmem>>, vector<16x128xbf16>
    %cst = arith.constant dense<0.000000e+00> : vector<16x128xf32>
    %2 = tpu.matmul %0, %1, %cst {dimension_numbers = #tpu.dot_dimension_numbers<[1], [0], [0], [1], [0, 0, 1, 1], [], []>} : vector<16x16xbf16>, vector<16x128xbf16>, vector<16x128xf32> -> vector<16x128xf32>
    %c0_3 = arith.constant 0 : index
    %c0_4 = arith.constant 0 : index
    %3 = vector.load %arg3[%c0_3, %c0_4] : memref<1x128xf32, #tpu.memory_space<vmem>>, vector<1x128xf32>
    %4 = vector.broadcast %3 : vector<1x128xf32> to vector<16x128xf32>
    %5 = arith.addf %2, %4 : vector<16x128xf32>
    %cst_5 = arith.constant 0.000000e+00 : f32
    %6 = vector.broadcast %cst_5 : f32 to vector<16x128xf32>
    %7 = arith.maximumf %5, %6 : vector<16x128xf32>
    %8 = arith.truncf %7 : vector<16x128xf32> to vector<16x128xbf16>
    %c0_6 = arith.constant 0 : index
    %c0_7 = arith.constant 0 : index
    %9 = vector.load %arg4[%c0_6, %c0_7] : memref<128x256xbf16, #tpu.memory_space<vmem>>, vector<128x256xbf16>
    %cst_8 = arith.constant dense<0.000000e+00> : vector<16x256xf32>
    %10 = tpu.matmul %8, %9, %cst_8 {dimension_numbers = #tpu.dot_dimension_numbers<[1], [0], [0], [1], [0, 0, 1, 1], [], []>} : vector<16x128xbf16>, vector<128x256xbf16>, vector<16x256xf32> -> vector<16x256xf32>
    %c0_9 = arith.constant 0 : index
    %c0_10 = arith.constant 0 : index
    %11 = vector.load %arg5[%c0_9, %c0_10] : memref<1x256xf32, #tpu.memory_space<vmem>>, vector<1x256xf32>
    %12 = vector.broadcast %11 : vector<1x256xf32> to vector<16x256xf32>
    %13 = arith.addf %10, %12 : vector<16x256xf32>
    %cst_11 = arith.constant 0.000000e+00 : f32
    %14 = vector.broadcast %cst_11 : f32 to vector<16x256xf32>
    %15 = arith.subf %14, %13 : vector<16x256xf32>
    %16 = math.exp %15 : vector<16x256xf32>
    %cst_12 = arith.constant 1.000000e+00 : f32
    %17 = vector.broadcast %cst_12 : f32 to vector<16x256xf32>
    %18 = arith.addf %17, %16 : vector<16x256xf32>
    %19 = tpu.reciprocal %18 {approx = true} : vector<16x256xf32> -> vector<16x256xf32>
    %20 = arith.truncf %19 : vector<16x256xf32> to vector<16x256xbf16>
    %c0_13 = arith.constant 0 : index
    %c0_14 = arith.constant 0 : index
    %21 = vector.load %arg6[%c0_13, %c0_14] : memref<16x256xbf16, #tpu.memory_space<vmem>>, vector<16x256xbf16>
    tpu.vector_store %arg6[%c0_13, %c0_14], %20 {strides = array<i32>} : memref<16x256xbf16, #tpu.memory_space<vmem>>, vector<16x256xbf16>,
    return
  }
  func.func @transform_0(%arg0: i32) -> (i32, i32) {
    %c0_i32 = arith.constant 0 : i32
    %c0_i32_0 = arith.constant 0 : i32
    return %arg0, %c0_i32 : i32, i32
  }
  func.func @transform_1(%arg0: i32) -> (i32, i32) {
    %c0_i32 = arith.constant 0 : i32
    %c0_i32_0 = arith.constant 0 : i32
    %c0_i32_1 = arith.constant 0 : i32
    return %c0_i32, %c0_i32_0 : i32, i32
  }
  func.func @transform_2(%arg0: i32) -> (i32, i32) {
    %c0_i32 = arith.constant 0 : i32
    %c0_i32_0 = arith.constant 0 : i32
    %c0_i32_1 = arith.constant 0 : i32
    return %c0_i32, %c0_i32_0 : i32, i32
  }
  func.func @transform_3(%arg0: i32) -> (i32, i32) {
    %c0_i32 = arith.constant 0 : i32
    %c0_i32_0 = arith.constant 0 : i32
    %c0_i32_1 = arith.constant 0 : i32
    return %c0_i32, %c0_i32_0 : i32, i32
  }
  func.func @transform_4(%arg0: i32) -> (i32, i32) {
    %c0_i32 = arith.constant 0 : i32
    %c0_i32_0 = arith.constant 0 : i32
    %c0_i32_1 = arith.constant 0 : i32
    return %c0_i32, %c0_i32_0 : i32, i32
  }
  func.func @transform_5(%arg0: i32) -> (i32, i32) {
    %c0_i32 = arith.constant 0 : i32
    %c0_i32_0 = arith.constant 0 : i32
    return %arg0, %c0_i32 : i32, i32
  }
}

module attributes {stable_mosaic.version = 11 : i64} {
  func.func @_mlp_kernel(%arg0: i32, %arg1: memref<16x16xbf16, #tpu.memory_space<vmem>>, %arg2: memref<16x128xbf16, #tpu.memory_space<vmem>>, %arg3: memref<1x128xf32, #tpu.memory_space<vmem>>, %arg4: memref<128x256xbf16, #tpu.memory_space<vmem>>, %arg5: memref<1x256xf32, #tpu.memory_space<vmem>>, %arg6: memref<16x256xbf16, #tpu.memory_space<vmem>>) attributes {dimension_semantics = [#tpu.dimension_semantics<parallel>], iteration_bounds = array<i64: 1>, scalar_prefetch = 0 : i64, scratch_operands = 0 : i64, tpu.core_type = #tpu.core_type<tc>, window_params = [{transform_indices = @transform_0, window_bounds = array<i64: 16, 16>}, {pipeline_mode = #tpu.pipeline_mode<synchronous>, transform_indices = @transform_1, window_bounds = array<i64: 16, 128>}, {pipeline_mode = #tpu.pipeline_mode<synchronous>, transform_indices = @transform_2, window_bounds = array<i64: 1, 128>}, {pipeline_mode = #tpu.pipeline_mode<synchronous>, transform_indices = @transform_3, window_bounds = array<i64: 128, 256>}, {pipeline_mode = #tpu.pipeline_mode<synchronous>, transform_indices = @transform_4, window_bounds = array<i64: 1, 256>}, {transform_indices = @transform_5, window_bounds = array<i64: 16, 256>}]} {
    %c0 = arith.constant 0 : index
    %c0_0 = arith.constant 0 : index
    %0 = vector.load %arg1[%c0, %c0_0] : memref<16x16xbf16, #tpu.memory_space<vmem>>, vector<16x16xbf16>
    %c0_1 = arith.constant 0 : index
    %c0_2 = arith.constant 0 : index
    %1 = vector.load %arg2[%c0_1, %c0_2] : memref<16x128xbf16, #tpu.memory_space<vmem>>, vector<16x128xbf16>
    %cst = arith.constant dense<0.000000e+00> : vector<16x128xf32>
    %2 = tpu.matmul %0, %1, %cst {dimension_numbers = #tpu.dot_dimension_numbers<[1], [0], [0], [1], [0, 0, 1, 1], [], []>} : vector<16x16xbf16>, vector<16x128xbf16>, vector<16x128xf32> -> vector<16x128xf32>
    %c0_3 = arith.constant 0 : index
    %c0_4 = arith.constant 0 : index
    %3 = vector.load %arg3[%c0_3, %c0_4] : memref<1x128xf32, #tpu.memory_space<vmem>>, vector<1x128xf32>
    %4 = vector.broadcast %3 : vector<1x128xf32> to vector<16x128xf32>
    %5 = arith.addf %2, %4 : vector<16x128xf32>
    %cst_5 = arith.constant 0.000000e+00 : f32
    %6 = vector.broadcast %cst_5 : f32 to vector<16x128xf32>
    %7 = arith.maximumf %5, %6 : vector<16x128xf32>
    %8 = arith.truncf %7 : vector<16x128xf32> to vector<16x128xbf16>
    %c0_6 = arith.constant 0 : index
    %c0_7 = arith.constant 0 : index
    %9 = vector.load %arg4[%c0_6, %c0_7] : memref<128x256xbf16, #tpu.memory_space<vmem>>, vector<128x256xbf16>
    %cst_8 = arith.constant dense<0.000000e+00> : vector<16x256xf32>
    %10 = tpu.matmul %8, %9, %cst_8 {dimension_numbers = #tpu.dot_dimension_numbers<[1], [0], [0], [1], [0, 0, 1, 1], [], []>} : vector<16x128xbf16>, vector<128x256xbf16>, vector<16x256xf32> -> vector<16x256xf32>
    %c0_9 = arith.constant 0 : index
    %c0_10 = arith.constant 0 : index
    %11 = vector.load %arg5[%c0_9, %c0_10] : memref<1x256xf32, #tpu.memory_space<vmem>>, vector<1x256xf32>
    %12 = vector.broadcast %11 : vector<1x256xf32> to vector<16x256xf32>
    %13 = arith.addf %10, %12 : vector<16x256xf32>
    %cst_11 = arith.constant 0.000000e+00 : f32
    %14 = vector.broadcast %cst_11 : f32 to vector<16x256xf32>
    %15 = arith.subf %14, %13 : vector<16x256xf32>
    %16 = math.exp %15 : vector<16x256xf32>
    %cst_12 = arith.constant 1.000000e+00 : f32
    %17 = vector.broadcast %cst_12 : f32 to vector<16x256xf32>
    %18 = arith.addf %17, %16 : vector<16x256xf32>
    %19 = tpu.reciprocal %18 {approx = true} : vector<16x256xf32> -> vector<16x256xf32>
    %20 = arith.truncf %19 : vector<16x256xf32> to vector<16x256xbf16>
    %c0_13 = arith.constant 0 : index
    %c0_14 = arith.constant 0 : index
    %21 = vector.load %arg6[%c0_13, %c0_14] : memref<16x256xbf16, #tpu.memory_space<vmem>>, vector<16x256xbf16>
    tpu.vector_store %arg6[%c0_13, %c0_14], %20 {strides = array<i32>} : memref<16x256xbf16, #tpu.memory_space<vmem>>, vector<16x256xbf16>,
    return
  }
  func.func @transform_0(%arg0: i32) -> (i32, i32) {
    %c0_i32 = arith.constant 0 : i32
    %c0_i32_0 = arith.constant 0 : i32
    return %arg0, %c0_i32 : i32, i32
  }
  func.func @transform_1(%arg0: i32) -> (i32, i32) {
    %c0_i32 = arith.constant 0 : i32
    %c0_i32_0 = arith.constant 0 : i32
    %c0_i32_1 = arith.constant 0 : i32
    return %c0_i32, %c0_i32_0 : i32, i32
  }
  func.func @transform_2(%arg0: i32) -> (i32, i32) {
    %c0_i32 = arith.constant 0 : i32
    %c0_i32_0 = arith.constant 0 : i32
    %c0_i32_1 = arith.constant 0 : i32
    return %c0_i32, %c0_i32_0 : i32, i32
  }
  func.func @transform_3(%arg0: i32) -> (i32, i32) {
    %c0_i32 = arith.constant 0 : i32
    %c0_i32_0 = arith.constant 0 : i32
    %c0_i32_1 = arith.constant 0 : i32
    return %c0_i32, %c0_i32_0 : i32, i32
  }
  func.func @transform_4(%arg0: i32) -> (i32, i32) {
    %c0_i32 = arith.constant 0 : i32
    %c0_i32_0 = arith.constant 0 : i32
    %c0_i32_1 = arith.constant 0 : i32
    return %c0_i32, %c0_i32_0 : i32, i32
  }
  func.func @transform_5(%arg0: i32) -> (i32, i32) {
    %c0_i32 = arith.constant 0 : i32
    %c0_i32_0 = arith.constant 0 : i32
    return %arg0, %c0_i32 : i32, i32
  }
}

</mosaic_0001>

<bundles_post_ra>
// kernel: _forward_padded.1
= control target key start
LH: loop header
LB: loop body
LE: loop exit
PB: predicated region body
PF: predicated region fallthrough
CT: control target
= control target key end

     0   :  { %10 = vsyncpa [#allocation3], 0  ;;  %s623_s0 = inlined_call_operand.hbm [shape: bf16[16,16], index: 0, kind: input, shape index: {}]   ;;  %s624_s1 = inlined_call_operand.hbm [shape: bf16[16,128], index: 1, kind: input, shape index: {}]   ;;  %s625_s2 = inlined_call_operand.vmem [shape: f32[1,128], index: 2, kind: input, shape index: {}]   ;;  %s626_s3 = inlined_call_operand.hbm [shape: bf16[128,256], index: 3, kind: input, shape index: {}]   ;;  %s627_s4 = inlined_call_operand.vmem [shape: f32[1,256], index: 4, kind: input, shape index: {}]   ;;  %s628_s5 = inlined_call_operand.hbm [shape: bf16[16,256], index: 5, kind: output, shape index: {}]  }
   0x1   :  { %11 = vsyncpa [#allocation6], 0 }
   0x2   :  { %12 = vsyncpa [#allocation4], 0  ;;  %s515_s18 = smov [#allocation5]   ;;  %s516_s20 = smov [#allocation2]  }
   0x3   :  { %s30_s19 = sshll.u32 %s515_s18, 4  ;;  %s18_s21 = sshll.u32 %s516_s20, 4  ;;  %s31_s19 = int_to_ptr.vmem [resolvable:$true] %s30_s19  ;;  %s556_s21 = int_to_ptr.vmem [resolvable:$true] %s18_s21 }
   0x4   :  { %s421_s24 = scalar_lea.hbm %s624_s1, 128 }
   0x5   :  { %p422_p0 = scmp.ne.s32.totalorder %s624_s1, %s421_s24  ;;  %p425_p1 = scmp.lt.u32.totalorder %s421_s24, %s624_s1 }
   0x7   :  { %p427_p2 = pnand %p425_p1, %p422_p0 }
   0x9   :  { %430 = shalt.err (!%p427_p2)
}
   0xa   :  { %s431_s29 = scalar_lea.vmem %s31_s19, 128  ;;  %p436_p4 = scmp.lt.s32.totalorder %s31_s19, %s31_s19 }
   0xb   :  { %p432_p3 = scmp.ne.s32.totalorder %s31_s19, %s431_s29  ;;  %p437_p5 = scmp.lt.s32.totalorder %s431_s29, %s431_s29 }
   0xd   :  { %p438_p6 = por %p437_p5, %p436_p4 }
   0xf   :  { %p439_p7 = pnand %p438_p6, %p432_p3 }
  0x11   :  { %442 = shalt.err (!%p439_p7)
}
  0x12   :  { %s517_s30 = smov 64   ;;  %s518_s6 = smov 4  }
  0x13   :  { %36 = dma.hbm_to_vmem [thread:$0]  %s624_s1, 128, %s31_s19, [#allocation6], %s517_s30, %s517_s30, %s518_s6  }
  0x14   :  { %s443_s11 = scalar_lea.hbm %s623_s0, 128 }
  0x15   :  { %p444_p8 = scmp.ne.s32.totalorder %s623_s0, %s443_s11  ;;  %p447_p9 = scmp.lt.u32.totalorder %s443_s11, %s623_s0 }
  0x17   :  { %p449_p10 = pnand %p447_p9, %p444_p8 }
  0x19   :  { %452 = shalt.err (!%p449_p10)
}
  0x1a   :  { %s453_s16 = scalar_lea.vmem %s556_s21, 128  ;;  %p458_p12 = scmp.lt.s32.totalorder %s556_s21, %s556_s21 }
  0x1b   :  { %p454_p11 = scmp.ne.s32.totalorder %s556_s21, %s453_s16  ;;  %p459_p13 = scmp.lt.s32.totalorder %s453_s16, %s453_s16 }
  0x1d   :  { %p460_p0 = por %p459_p13, %p458_p12 }
  0x1f   :  { %p461_p1 = pnand %p460_p0, %p454_p11 }
  0x21   :  { %464 = shalt.err (!%p461_p1)
}
  0x22   :  { %24 = dma.hbm_to_vmem [thread:$0]  %s623_s0, 128, %s556_s21, [#allocation3], %s517_s30, %s517_s30, %s518_s6  }
  0x23   :  { %s519_s18 = smov [#allocation7]   ;;  %s465_s23 = scalar_lea.hbm %s626_s3, 2048 }
  0x24   :  { %s44_s19 = sshll.u32 %s519_s18, 4  ;;  %p466_p2 = scmp.ne.s32.totalorder %s626_s3, %s465_s23  ;;  %s45_s19 = int_to_ptr.vmem [resolvable:$true] %s44_s19 }
  0x25   :  { %p469_p3 = scmp.lt.u32.totalorder %s465_s23, %s626_s3 }
  0x27   :  { %p471_p4 = pnand %p469_p3, %p466_p2 }
  0x29   :  { %474 = shalt.err (!%p471_p4)
}
  0x2a   :  { %s475_s28 = scalar_lea.vmem %s45_s19, 2048  ;;  %p480_p6 = scmp.lt.s32.totalorder %s45_s19, %s45_s19 }
  0x2b   :  { %p476_p5 = scmp.ne.s32.totalorder %s45_s19, %s475_s28  ;;  %p481_p7 = scmp.lt.s32.totalorder %s475_s28, %s475_s28 }
  0x2d   :  { %p482_p8 = por %p481_p7, %p480_p6 }
  0x2f   :  { %p483_p9 = pnand %p482_p8, %p476_p5 }
  0x31   :  { %486 = shalt.err (!%p483_p9)
}
  0x32   :  { %s520_s0 = smov 128   ;;  %s521_s21 = smov 8  }
  0x33   :  { %50 = dma.hbm_to_vmem [thread:$0]  %s626_s3, 2048, %s45_s19, [#allocation6], %s520_s0, %s520_s0, %s521_s21  }
  0x34   :  { %509 = dma.done.wait [#allocation3], 128  }
  0x35   :  { %510 = vsyncadd [#allocation3], 4294967168 }
  0x36   :  { %511 = dma.done.wait [#allocation6], 2176  }
  0x37   :  { %512 = vsyncadd [#allocation6], 4294965120  ;;  %v522_v0 = vmov 0.0   ;;  %vm523_vm0 = vmmov 0   ;;  %v379_v1 = vld [vmem:[#allocation5] sm:$0xff]   ;;  %v380_v2 = vld [vmem:[#allocation2] sm:$0xff]   ;;  %v151_v30 = vlaneseq }
  0x38   :  { %362 = vmatprep.subr.bf16.mxu0 %v522_v0  ;;  %364 = vmatprep.mubr.msk.bf16.mxu0 %vm523_vm0, %v522_v0  ;;  %vm85_vm1 = vcmask 130048   ;;  %v381_v3 = vld [vmem:[#allocation7 + $0x4] ss:$8 sps:$4 sm:$0xff]   ;;  %v383_v4 = vld [vmem:[#allocation7] ss:$8 sps:$4 sm:$0xff]   ;;  %v524_v19 = vmov 0  }
  0x39   :  { %363 = vmatpush3.bf16.msra.mxu0 %v379_v1  ;;  %241 = vmatprep.subr.bf16.mxu1 %v381_v3  ;;  %v384_v5 = vld [vmem:[#allocation7 + $0x14] ss:$8 sps:$4 sm:$0xff]   ;;  %v386_v6 = vld [vmem:[#allocation7 + $0x10] ss:$8 sps:$4 sm:$0xff]   ;;  %v387_v7 = vld [vmem:[#allocation7 + $0x24] ss:$8 sps:$4 sm:$0xff]  }
  0x3a   :  { %242 = vmatpush1.bf16.msra.mxu1 %v383_v4  ;;  %v389_v8 = vld [vmem:[#allocation7 + $0x20] ss:$8 sps:$4 sm:$0xff]   ;;  %v390_v9 = vld [vmem:[#allocation7 + $0x34] ss:$8 sps:$4 sm:$0xff]   ;;  %v392_v10 = vld [vmem:[#allocation7 + $0x30] ss:$8 sps:$4 sm:$0xff]   ;;  %273 = vmatprep.mubr.bf16.mxu1 %v524_v19 }
  0x3b   :  { %243 = vmatprep.subr.bf16.mxu1 %v384_v5  ;;  %v393_v11 = vld [vmem:[#allocation7 + $0x44] ss:$8 sps:$4 sm:$0xff]   ;;  %v395_v12 = vld [vmem:[#allocation7 + $0x40] ss:$8 sps:$4 sm:$0xff]   ;;  %v396_v13 = vld [vmem:[#allocation7 + $0x54] ss:$8 sps:$4 sm:$0xff]  }
  0x3c   :  { %365 = vmatmul.mubr.msk.bf16.vlgmr.msra.gmra.mrb[0].mxu0 %vm85_vm1, %v380_v2  ;;  %v398_v14 = vld [vmem:[#allocation7 + $0x50] ss:$8 sps:$4 sm:$0xff]   ;;  %v399_v15 = vld [vmem:[#allocation7 + $0x64] ss:$8 sps:$4 sm:$0xff]   ;;  %v401_v16 = vld [vmem:[#allocation7 + $0x60] ss:$8 sps:$4 sm:$0xff]  }
  0x3d   :  { %v402_v17 = vld [vmem:[#allocation7 + $0x74] ss:$8 sps:$4 sm:$0xff]   ;;  %v404_v18 = vld [vmem:[#allocation7 + $0x70] ss:$8 sps:$4 sm:$0xff]   ;;  %v152_v31 = vshrl.u32 %v151_v30, 7 }
  0x3e   :  { %244 = vmatpush1.bf16.msra.mxu1 %v386_v6  ;;  %v336_v20 = vld [vmem:[%s625_s2] ss:$0 sm:$0xff]  ;;  %s525_s2 = smov [#allocation8]  }
  0x3f   :  { %245 = vmatprep.subr.bf16.mxu1 %v387_v7  ;;  %v153_v32 = vsub.s32 0, %v152_v31  ;;  %v149_v33 = vld [vmem:[%s627_s4] sm:$0x3]  ;;  %v157_v34 = vsub.s32 1, %v152_v31  ;;  %s323_s4 = sshll.u32 %s525_s2, 4  ;;  %s324_s4 = int_to_ptr.vmem [resolvable:$true] %s323_s4 }
  0x40   :  { %s487_s9 = scalar_lea.vmem %s324_s4, 256  ;;  %p492_p11 = scmp.lt.s32.totalorder %s324_s4, %s324_s4 }
  0x41   :  { %v154_v35 = vrot.slane %v149_v33, %v153_v32  ;;  %v158_v36 = vrot.slane %v149_v33, %v157_v34  ;;  %p488_p10 = scmp.ne.s32.totalorder %s324_s4, %s487_s9  ;;  %p493_p12 = scmp.lt.s32.totalorder %s487_s9, %s487_s9 }
  0x42   :  { %246 = vmatpush1.bf16.msra.mxu1 %v389_v8 }
  0x43   :  { %247 = vmatprep.subr.bf16.mxu1 %v390_v9  ;;  %p494_p13 = por %p493_p12, %p492_p11 }
  0x45   :  { %p495_p0 = pnand %p494_p13, %p488_p10 }
  0x46   :  { %248 = vmatpush1.bf16.msra.mxu1 %v392_v10 }
  0x47   :  { %249 = vmatprep.subr.bf16.mxu1 %v393_v11 }
  0x4a   :  { %250 = vmatpush1.bf16.msra.mxu1 %v395_v12 }
  0x4b   :  { %251 = vmatprep.subr.bf16.mxu1 %v396_v13 }
  0x4e   :  { %252 = vmatpush1.bf16.msra.mxu1 %v398_v14 }
  0x4f   :  { %253 = vmatprep.subr.bf16.mxu1 %v399_v15 }
  0x52   :  { %254 = vmatpush1.bf16.msra.mxu1 %v401_v16 }
  0x53   :  { %255 = vmatprep.subr.bf16.mxu1 %v402_v17 }
  0x56   :  { %256 = vmatpush1.bf16.msra.mxu1 %v404_v18 }
 0x10f   :  { %v123_v21 = vpop.f32.mrb[0].mxu0 }
 0x110   :  { %v124_v22 = vadd.f32 %v336_v20, %v123_v21  ;;  %v366_v23 = vpop.f32.mrb[1].mxu0 }
 0x111   :  { %v126_v24 = vpop.f32.mrb[2].mxu0 }
 0x112   :  { %v127_v25 = vadd.f32 %v336_v20, %v126_v24  ;;  %v367_v26 = vpop.f32.mrb[3].mxu0  ;;  %v130_v27 = vmax.f32 %v124_v22, 0.0 }
 0x114   :  { %v131_v28 = vmax.f32 %v127_v25, 0.0 }
 0x116   :  { %v132_v29 = vpack.c.bf16 %v131_v28, %v130_v27 }
 0x118   :  { %274 = vmatmul.mubr.bf16.vlgmr.msra.gmra.mrb[0].mxu1 %v132_v29 }
 0x1eb   :  { %v275_v37 = vpop.f32.mrb[0].mxu1 }
 0x1ec   :  { %v276_v38 = vadd.f32 %v275_v37, %v154_v35  ;;  %v277_v39 = vpop.f32.mrb[1].mxu1 }
 0x1ed   :  { %v278_v40 = vadd.f32 %v277_v39, %v158_v36  ;;  %v279_v41 = vpop.f32.mrb[2].mxu1 }
 0x1ee   :  { %v284_v42 = vsub.f32 0.0, %v276_v38  ;;  %v280_v43 = vadd.f32 %v279_v41, %v154_v35  ;;  %v281_v44 = vpop.f32.mrb[3].mxu1 }
 0x1ef   :  { %v285_v45 = vsub.f32 0.0, %v278_v40  ;;  %v282_v46 = vadd.f32 %v281_v44, %v158_v36 }
 0x1f0   :  { %v288_v47 = vmul.f32 1.442695, %v284_v42  ;;  %v286_v48 = vsub.f32 0.0, %v280_v43 }
 0x1f1   :  { %v290_v49 = vmul.f32 1.442695, %v285_v45  ;;  %v287_v50 = vsub.f32 0.0, %v282_v46 }
 0x1f2   :  { %405 = vpow2.f32 %v288_v47  ;;  %v292_v51 = vmul.f32 1.442695, %v286_v48 }
 0x1f3   :  { %407 = vpow2.f32 %v290_v49  ;;  %v294_v52 = vmul.f32 1.442695, %v287_v50 }
 0x1f4   :  { %409 = vpow2.f32 %v292_v51 }
 0x1f5   :  { %411 = vpow2.f32 %v294_v52 }
 0x1fc   :  { %v406_v53 = vpop.eup %405 }
 0x1fd   :  { %v408_v54 = vpop.eup %407  ;;  %v296_v55 = vadd.f32 1.0, %v406_v53 }
 0x1fe   :  { %v410_v56 = vpop.eup %409  ;;  %v297_v57 = vadd.f32 1.0, %v408_v54 }
 0x1ff   :  { %v412_v58 = vpop.eup %411  ;;  %413 = vrcp.f32 %v296_v55  ;;  %v298_v59 = vadd.f32 1.0, %v410_v56 }
 0x200   :  { %415 = vrcp.f32 %v297_v57  ;;  %v299_v60 = vadd.f32 1.0, %v412_v58 }
 0x201   :  { %417 = vrcp.f32 %v298_v59 }
 0x202   :  { %419 = vrcp.f32 %v299_v60 }
 0x209   :  { %v414_v61 = vpop.eup %413 }
 0x20a   :  { %v416_v62 = vpop.eup %415 }
 0x20b   :  { %v418_v63 = vpop.eup %417  ;;  %v358_v0 = vpack.c.bf16 %v416_v62, %v414_v61 }
 0x20c   :  { %v420_v1 = vpop.eup %419 }
 0x20d   :  { %v359_v2 = vpack.c.bf16 %v420_v1, %v418_v63  ;;  %316 = vst [vmem:[#allocation8] sm:$0xff] %v358_v0 }
 0x20f   :  { %317 = vst [vmem:[#allocation8 + $0x8] sm:$0xff] %v359_v2 }
 0x210   :  { %498 = shalt.err (!%p495_p0)
}
 0x211   :  { %s499_s12 = scalar_lea.hbm %s628_s5, 256 }
 0x212   :  { %p500_p1 = scmp.ne.s32.totalorder %s628_s5, %s499_s12  ;;  %p503_p2 = scmp.lt.u32.totalorder %s499_s12, %s628_s5 }
 0x214   :  { %p505_p3 = pnand %p503_p2, %p500_p1 }
 0x216   :  { %508 = shalt.err (!%p505_p3)
}
 0x217   :  { %329 = dma.vmem_to_hbm [thread:$0]  %s324_s4, 256, %s628_s5, [#allocation4], %s520_s0, %s520_s0, %s521_s21  }
 0x218   :  { %513 = dma.done.wait [#allocation4], 256  }
 0x219   :  { %514 = vsyncadd [#allocation4], 4294967040 }
 0x21a   :  { %333 = vsyncpa [#allocation3], 1 }
 0x21b   :  { %334 = vsyncpa [#allocation6], 1 }
 0x21c   :  { %335 = vsyncpa [#allocation4], 1 }

// kernel: _forward_padded.1
= control target key start
LH: loop header
LB: loop body
LE: loop exit
PB: predicated region body
PF: predicated region fallthrough
CT: control target
= control target key end

     0   :  { %10 = vsyncpa [#allocation3], 0  ;;  %s623_s0 = inlined_call_operand.hbm [shape: bf16[16,16], index: 0, kind: input, shape index: {}]   ;;  %s624_s1 = inlined_call_operand.hbm [shape: bf16[16,128], index: 1, kind: input, shape index: {}]   ;;  %s625_s2 = inlined_call_operand.vmem [shape: f32[1,128], index: 2, kind: input, shape index: {}]   ;;  %s626_s3 = inlined_call_operand.hbm [shape: bf16[128,256], index: 3, kind: input, shape index: {}]   ;;  %s627_s4 = inlined_call_operand.vmem [shape: f32[1,256], index: 4, kind: input, shape index: {}]   ;;  %s628_s5 = inlined_call_operand.hbm [shape: bf16[16,256], index: 5, kind: output, shape index: {}]  }
   0x1   :  { %11 = vsyncpa [#allocation6], 0 }
   0x2   :  { %12 = vsyncpa [#allocation4], 0  ;;  %s515_s18 = smov [#allocation5]   ;;  %s516_s20 = smov [#allocation2]  }
   0x3   :  { %s30_s19 = sshll.u32 %s515_s18, 4  ;;  %s18_s21 = sshll.u32 %s516_s20, 4  ;;  %s31_s19 = int_to_ptr.vmem [resolvable:$true] %s30_s19  ;;  %s556_s21 = int_to_ptr.vmem [resolvable:$true] %s18_s21 }
   0x4   :  { %s421_s24 = scalar_lea.hbm %s624_s1, 128 }
   0x5   :  { %p422_p0 = scmp.ne.s32.totalorder %s624_s1, %s421_s24  ;;  %p425_p1 = scmp.lt.u32.totalorder %s421_s24, %s624_s1 }
   0x7   :  { %p427_p2 = pnand %p425_p1, %p422_p0 }
   0x9   :  { %430 = shalt.err (!%p427_p2)
}
   0xa   :  { %s431_s29 = scalar_lea.vmem %s31_s19, 128  ;;  %p436_p4 = scmp.lt.s32.totalorder %s31_s19, %s31_s19 }
   0xb   :  { %p432_p3 = scmp.ne.s32.totalorder %s31_s19, %s431_s29  ;;  %p437_p5 = scmp.lt.s32.totalorder %s431_s29, %s431_s29 }
   0xd   :  { %p438_p6 = por %p437_p5, %p436_p4 }
   0xf   :  { %p439_p7 = pnand %p438_p6, %p432_p3 }
  0x11   :  { %442 = shalt.err (!%p439_p7)
}
  0x12   :  { %s517_s30 = smov 64   ;;  %s518_s6 = smov 4  }
  0x13   :  { %36 = dma.hbm_to_vmem [thread:$0]  %s624_s1, 128, %s31_s19, [#allocation6], %s517_s30, %s517_s30, %s518_s6  }
  0x14   :  { %s443_s11 = scalar_lea.hbm %s623_s0, 128 }
  0x15   :  { %p444_p8 = scmp.ne.s32.totalorder %s623_s0, %s443_s11  ;;  %p447_p9 = scmp.lt.u32.totalorder %s443_s11, %s623_s0 }
  0x17   :  { %p449_p10 = pnand %p447_p9, %p444_p8 }
  0x19   :  { %452 = shalt.err (!%p449_p10)
}
  0x1a   :  { %s453_s16 = scalar_lea.vmem %s556_s21, 128  ;;  %p458_p12 = scmp.lt.s32.totalorder %s556_s21, %s556_s21 }
  0x1b   :  { %p454_p11 = scmp.ne.s32.totalorder %s556_s21, %s453_s16  ;;  %p459_p13 = scmp.lt.s32.totalorder %s453_s16, %s453_s16 }
  0x1d   :  { %p460_p0 = por %p459_p13, %p458_p12 }
  0x1f   :  { %p461_p1 = pnand %p460_p0, %p454_p11 }
  0x21   :  { %464 = shalt.err (!%p461_p1)
}
  0x22   :  { %24 = dma.hbm_to_vmem [thread:$0]  %s623_s0, 128, %s556_s21, [#allocation3], %s517_s30, %s517_s30, %s518_s6  }
  0x23   :  { %s519_s18 = smov [#allocation7]   ;;  %s465_s23 = scalar_lea.hbm %s626_s3, 2048 }
  0x24   :  { %s44_s19 = sshll.u32 %s519_s18, 4  ;;  %p466_p2 = scmp.ne.s32.totalorder %s626_s3, %s465_s23  ;;  %s45_s19 = int_to_ptr.vmem [resolvable:$true] %s44_s19 }
  0x25   :  { %p469_p3 = scmp.lt.u32.totalorder %s465_s23, %s626_s3 }
  0x27   :  { %p471_p4 = pnand %p469_p3, %p466_p2 }
  0x29   :  { %474 = shalt.err (!%p471_p4)
}
  0x2a   :  { %s475_s28 = scalar_lea.vmem %s45_s19, 2048  ;;  %p480_p6 = scmp.lt.s32.totalorder %s45_s19, %s45_s19 }
  0x2b   :  { %p476_p5 = scmp.ne.s32.totalorder %s45_s19, %s475_s28  ;;  %p481_p7 = scmp.lt.s32.totalorder %s475_s28, %s475_s28 }
  0x2d   :  { %p482_p8 = por %p481_p7, %p480_p6 }
  0x2f   :  { %p483_p9 = pnand %p482_p8, %p476_p5 }
  0x31   :  { %486 = shalt.err (!%p483_p9)
}
  0x32   :  { %s520_s0 = smov 128   ;;  %s521_s21 = smov 8  }
  0x33   :  { %50 = dma.hbm_to_vmem [thread:$0]  %s626_s3, 2048, %s45_s19, [#allocation6], %s520_s0, %s520_s0, %s521_s21  }
  0x34   :  { %509 = dma.done.wait [#allocation3], 128  }
  0x35   :  { %510 = vsyncadd [#allocation3], 4294967168 }
  0x36   :  { %511 = dma.done.wait [#allocation6], 2176  }
  0x37   :  { %512 = vsyncadd [#allocation6], 4294965120  ;;  %v522_v0 = vmov 0.0   ;;  %vm523_vm0 = vmmov 0   ;;  %v379_v1 = vld [vmem:[#allocation5] sm:$0xff]   ;;  %v380_v2 = vld [vmem:[#allocation2] sm:$0xff]   ;;  %v151_v30 = vlaneseq }
  0x38   :  { %362 = vmatprep.subr.bf16.mxu0 %v522_v0  ;;  %364 = vmatprep.mubr.msk.bf16.mxu0 %vm523_vm0, %v522_v0  ;;  %vm85_vm1 = vcmask 130048   ;;  %v381_v3 = vld [vmem:[#allocation7 + $0x4] ss:$8 sps:$4 sm:$0xff]   ;;  %v383_v4 = vld [vmem:[#allocation7] ss:$8 sps:$4 sm:$0xff]   ;;  %v524_v19 = vmov 0  }
  0x39   :  { %363 = vmatpush3.bf16.msra.mxu0 %v379_v1  ;;  %241 = vmatprep.subr.bf16.mxu1 %v381_v3  ;;  %v384_v5 = vld [vmem:[#allocation7 + $0x14] ss:$8 sps:$4 sm:$0xff]   ;;  %v386_v6 = vld [vmem:[#allocation7 + $0x10] ss:$8 sps:$4 sm:$0xff]   ;;  %v387_v7 = vld [vmem:[#allocation7 + $0x24] ss:$8 sps:$4 sm:$0xff]  }
  0x3a   :  { %242 = vmatpush1.bf16.msra.mxu1 %v383_v4  ;;  %v389_v8 = vld [vmem:[#allocation7 + $0x20] ss:$8 sps:$4 sm:$0xff]   ;;  %v390_v9 = vld [vmem:[#allocation7 + $0x34] ss:$8 sps:$4 sm:$0xff]   ;;  %v392_v10 = vld [vmem:[#allocation7 + $0x30] ss:$8 sps:$4 sm:$0xff]   ;;  %273 = vmatprep.mubr.bf16.mxu1 %v524_v19 }
  0x3b   :  { %243 = vmatprep.subr.bf16.mxu1 %v384_v5  ;;  %v393_v11 = vld [vmem:[#allocation7 + $0x44] ss:$8 sps:$4 sm:$0xff]   ;;  %v395_v12 = vld [vmem:[#allocation7 + $0x40] ss:$8 sps:$4 sm:$0xff]   ;;  %v396_v13 = vld [vmem:[#allocation7 + $0x54] ss:$8 sps:$4 sm:$0xff]  }
  0x3c   :  { %365 = vmatmul.mubr.msk.bf16.vlgmr.msra.gmra.mrb[0].mxu0 %vm85_vm1, %v380_v2  ;;  %v398_v14 = vld [vmem:[#allocation7 + $0x50] ss:$8 sps:$4 sm:$0xff]   ;;  %v399_v15 = vld [vmem:[#allocation7 + $0x64] ss:$8 sps:$4 sm:$0xff]   ;;  %v401_v16 = vld [vmem:[#allocation7 + $0x60] ss:$8 sps:$4 sm:$0xff]  }
  0x3d   :  { %v402_v17 = vld [vmem:[#allocation7 + $0x74] ss:$8 sps:$4 sm:$0xff]   ;;  %v404_v18 = vld [vmem:[#allocation7 + $0x70] ss:$8 sps:$4 sm:$0xff]   ;;  %v152_v31 = vshrl.u32 %v151_v30, 7 }
  0x3e   :  { %244 = vmatpush1.bf16.msra.mxu1 %v386_v6  ;;  %v336_v20 = vld [vmem:[%s625_s2] ss:$0 sm:$0xff]  ;;  %s525_s2 = smov [#allocation8]  }
  0x3f   :  { %245 = vmatprep.subr.bf16.mxu1 %v387_v7  ;;  %v153_v32 = vsub.s32 0, %v152_v31  ;;  %v149_v33 = vld [vmem:[%s627_s4] sm:$0x3]  ;;  %v157_v34 = vsub.s32 1, %v152_v31  ;;  %s323_s4 = sshll.u32 %s525_s2, 4  ;;  %s324_s4 = int_to_ptr.vmem [resolvable:$true] %s323_s4 }
  0x40   :  { %s487_s9 = scalar_lea.vmem %s324_s4, 256  ;;  %p492_p11 = scmp.lt.s32.totalorder %s324_s4, %s324_s4 }
  0x41   :  { %v154_v35 = vrot.slane %v149_v33, %v153_v32  ;;  %v158_v36 = vrot.slane %v149_v33, %v157_v34  ;;  %p488_p10 = scmp.ne.s32.totalorder %s324_s4, %s487_s9  ;;  %p493_p12 = scmp.lt.s32.totalorder %s487_s9, %s487_s9 }
  0x42   :  { %246 = vmatpush1.bf16.msra.mxu1 %v389_v8 }
  0x43   :  { %247 = vmatprep.subr.bf16.mxu1 %v390_v9  ;;  %p494_p13 = por %p493_p12, %p492_p11 }
  0x45   :  { %p495_p0 = pnand %p494_p13, %p488_p10 }
  0x46   :  { %248 = vmatpush1.bf16.msra.mxu1 %v392_v10 }
  0x47   :  { %249 = vmatprep.subr.bf16.mxu1 %v393_v11 }
  0x4a   :  { %250 = vmatpush1.bf16.msra.mxu1 %v395_v12 }
  0x4b   :  { %251 = vmatprep.subr.bf16.mxu1 %v396_v13 }
  0x4e   :  { %252 = vmatpush1.bf16.msra.mxu1 %v398_v14 }
  0x4f   :  { %253 = vmatprep.subr.bf16.mxu1 %v399_v15 }
  0x52   :  { %254 = vmatpush1.bf16.msra.mxu1 %v401_v16 }
  0x53   :  { %255 = vmatprep.subr.bf16.mxu1 %v402_v17 }
  0x56   :  { %256 = vmatpush1.bf16.msra.mxu1 %v404_v18 }
 0x10f   :  { %v123_v21 = vpop.f32.mrb[0].mxu0 }
 0x110   :  { %v124_v22 = vadd.f32 %v336_v20, %v123_v21  ;;  %v366_v23 = vpop.f32.mrb[1].mxu0 }
 0x111   :  { %v126_v24 = vpop.f32.mrb[2].mxu0 }
 0x112   :  { %v127_v25 = vadd.f32 %v336_v20, %v126_v24  ;;  %v367_v26 = vpop.f32.mrb[3].mxu0  ;;  %v130_v27 = vmax.f32 %v124_v22, 0.0 }
 0x114   :  { %v131_v28 = vmax.f32 %v127_v25, 0.0 }
 0x116   :  { %v132_v29 = vpack.c.bf16 %v131_v28, %v130_v27 }
 0x118   :  { %274 = vmatmul.mubr.bf16.vlgmr.msra.gmra.mrb[0].mxu1 %v132_v29 }
 0x1eb   :  { %v275_v37 = vpop.f32.mrb[0].mxu1 }
 0x1ec   :  { %v276_v38 = vadd.f32 %v275_v37, %v154_v35  ;;  %v277_v39 = vpop.f32.mrb[1].mxu1 }
 0x1ed   :  { %v278_v40 = vadd.f32 %v277_v39, %v158_v36  ;;  %v279_v41 = vpop.f32.mrb[2].mxu1 }
 0x1ee   :  { %v284_v42 = vsub.f32 0.0, %v276_v38  ;;  %v280_v43 = vadd.f32 %v279_v41, %v154_v35  ;;  %v281_v44 = vpop.f32.mrb[3].mxu1 }
 0x1ef   :  { %v285_v45 = vsub.f32 0.0, %v278_v40  ;;  %v282_v46 = vadd.f32 %v281_v44, %v158_v36 }
 0x1f0   :  { %v288_v47 = vmul.f32 1.442695, %v284_v42  ;;  %v286_v48 = vsub.f32 0.0, %v280_v43 }
 0x1f1   :  { %v290_v49 = vmul.f32 1.442695, %v285_v45  ;;  %v287_v50 = vsub.f32 0.0, %v282_v46 }
 0x1f2   :  { %405 = vpow2.f32 %v288_v47  ;;  %v292_v51 = vmul.f32 1.442695, %v286_v48 }
 0x1f3   :  { %407 = vpow2.f32 %v290_v49  ;;  %v294_v52 = vmul.f32 1.442695, %v287_v50 }
 0x1f4   :  { %409 = vpow2.f32 %v292_v51 }
 0x1f5   :  { %411 = vpow2.f32 %v294_v52 }
 0x1fc   :  { %v406_v53 = vpop.eup %405 }
 0x1fd   :  { %v408_v54 = vpop.eup %407  ;;  %v296_v55 = vadd.f32 1.0, %v406_v53 }
 0x1fe   :  { %v410_v56 = vpop.eup %409  ;;  %v297_v57 = vadd.f32 1.0, %v408_v54 }
 0x1ff   :  { %v412_v58 = vpop.eup %411  ;;  %413 = vrcp.f32 %v296_v55  ;;  %v298_v59 = vadd.f32 1.0, %v410_v56 }
 0x200   :  { %415 = vrcp.f32 %v297_v57  ;;  %v299_v60 = vadd.f32 1.0, %v412_v58 }
 0x201   :  { %417 = vrcp.f32 %v298_v59 }
 0x202   :  { %419 = vrcp.f32 %v299_v60 }
 0x209   :  { %v414_v61 = vpop.eup %413 }
 0x20a   :  { %v416_v62 = vpop.eup %415 }
 0x20b   :  { %v418_v63 = vpop.eup %417  ;;  %v358_v0 = vpack.c.bf16 %v416_v62, %v414_v61 }
 0x20c   :  { %v420_v1 = vpop.eup %419 }
 0x20d   :  { %v359_v2 = vpack.c.bf16 %v420_v1, %v418_v63  ;;  %316 = vst [vmem:[#allocation8] sm:$0xff] %v358_v0 }
 0x20f   :  { %317 = vst [vmem:[#allocation8 + $0x8] sm:$0xff] %v359_v2 }
 0x210   :  { %498 = shalt.err (!%p495_p0)
}
 0x211   :  { %s499_s12 = scalar_lea.hbm %s628_s5, 256 }
 0x212   :  { %p500_p1 = scmp.ne.s32.totalorder %s628_s5, %s499_s12  ;;  %p503_p2 = scmp.lt.u32.totalorder %s499_s12, %s628_s5 }
 0x214   :  { %p505_p3 = pnand %p503_p2, %p500_p1 }
 0x216   :  { %508 = shalt.err (!%p505_p3)
}
 0x217   :  { %329 = dma.vmem_to_hbm [thread:$0]  %s324_s4, 256, %s628_s5, [#allocation4], %s520_s0, %s520_s0, %s521_s21  }
 0x218   :  { %513 = dma.done.wait [#allocation4], 256  }
 0x219   :  { %514 = vsyncadd [#allocation4], 4294967040 }
 0x21a   :  { %333 = vsyncpa [#allocation3], 1 }
 0x21b   :  { %334 = vsyncpa [#allocation6], 1 }
 0x21c   :  { %335 = vsyncpa [#allocation4], 1 }

</bundles_post_ra>
